<compile_context>
chip_gen: v5e
topology: v5e:2x2
jax: 0.10.0
libtpu: 0.0.40
codegen_flags: <defaults>
</compile_context>

<pallas_src>
import functools

import jax
import jax.numpy as jnp
from jax import lax
from jax.experimental import pallas as pl
from jax.experimental.pallas import tpu as pltpu

FILTER_SIZE = 64   # filterSize in the PyTorch module
KERNEL_SIZE = 3


def res_dila_block_kernel(x_ref, w1_ref, b1_ref, w2_ref, b2_ref, o_ref, *, dila):
    nb, L, C = x_ref.shape
    M = nb * L
    x = x_ref[...].astype(jnp.float32).reshape(M, C)

    # Hoisted once per invocation (shared by both convs): position-in-sample
    # iota and the "this tap falls in the zero padding" masks.
    pos = lax.broadcasted_iota(jnp.int32, (M, 1), 0) % L
    valid_m = pos >= dila           # tap k=0 reads position l - dila
    valid_p = pos < (L - dila)      # tap k=2 reads position l + dila
    sh_m = dila % M                 # roll so rolled[l] = h[l - dila]
    sh_p = (M - dila % M) % M       # roll so rolled[l] = h[l + dila]

    def fused_dilated_conv(h, w_ref_, b_ref_):
        # h: (M, C) f32 -> (M, C) f32 via one bf16 MXU matmul with K = 3*C.
        h_m = jnp.where(valid_m, pltpu.roll(h, shift=sh_m, axis=0), 0.0)
        h_p = jnp.where(valid_p, pltpu.roll(h, shift=sh_p, axis=0), 0.0)
        h3 = jnp.concatenate([h_m, h, h_p], axis=-1).astype(jnp.bfloat16)
        acc = jnp.dot(h3, w_ref_[...], preferred_element_type=jnp.float32)
        return acc + b_ref_[...]          # bias added once, in f32

    h = jnp.maximum(x, 0.0)                       # ReLU (f32)
    h = fused_dilated_conv(h, w1_ref, b1_ref)     # Conv1d #1
    h = jnp.maximum(h, 0.0)                       # ReLU (f32)
    h = fused_dilated_conv(h, w2_ref, b2_ref)     # Conv1d #2
    o_ref[...] = (x + h).reshape(nb, L, C).astype(o_ref.dtype)   # residual


def _choose_block_batch(N, L, C, itemsize=4, target_tile_bytes=1 << 20):
    """Largest divisor of N whose activation tile stays under target bytes,
    preferring >= 2 grid steps so v7x's second TensorCore gets work and the
    BlockSpec pipeline can overlap DMA with compute."""
    per_sample = max(L * C * itemsize, 1)
    divisors = [d for d in range(1, N + 1) if N % d == 0]
    fitting = [d for d in divisors if d * per_sample <= target_tile_bytes] or [1]
    preferred = [d for d in fitting if N // d >= 2]
    return max(preferred) if preferred else max(fitting)


def res_dila_cnn_block(x_nlc, w1, b1, w2, b2, *, dila, block_batch=None):
    """x_nlc: (N, L, C) f32.  w*: (3, C_in, C_out).  b*: (C,)."""
    N, L, C = x_nlc.shape
    nb = _choose_block_batch(N, L, C) if block_batch is None else block_batch
    assert N % nb == 0

    # Fused-tap weights: (3, Cin, Cout) -> (3*Cin, Cout), bf16 for the MXU.
    w1f = w1.reshape(KERNEL_SIZE * C, C).astype(jnp.bfloat16)
    w2f = w2.reshape(KERNEL_SIZE * C, C).astype(jnp.bfloat16)
    b1_2d = b1.reshape(1, C).astype(jnp.float32)
    b2_2d = b2.reshape(1, C).astype(jnp.float32)

    kernel = functools.partial(res_dila_block_kernel, dila=dila)
    return pl.pallas_call(
        kernel,
        out_shape=jax.ShapeDtypeStruct((N, L, C), x_nlc.dtype),
        grid_spec=pltpu.PrefetchScalarGridSpec(
            num_scalar_prefetch=0,
            grid=(N // nb,),
            in_specs=[
                pl.BlockSpec((nb, L, C), lambda n: (n, 0, 0)),
                pl.BlockSpec((KERNEL_SIZE * C, C), lambda n: (0, 0)),
                pl.BlockSpec((1, C), lambda n: (0, 0)),
                pl.BlockSpec((KERNEL_SIZE * C, C), lambda n: (0, 0)),
                pl.BlockSpec((1, C), lambda n: (0, 0)),
            ],
            out_specs=pl.BlockSpec((nb, L, C), lambda n: (n, 0, 0)),
        ),
        compiler_params=pltpu.CompilerParams(dimension_semantics=("parallel",)),
    )(x_nlc, w1f, b1_2d, w2f, b2_2d)


def reference_ncl(x_ncl, w1, b1, w2, b2, *, dila, conv_dtype=jnp.float32):
    """Pure-JAX reference in PyTorch's NCL layout. conv_dtype=bfloat16 mimics
    the kernel's bf16 MXU inputs (accumulation stays f32 in both)."""
    def conv(h, w, b):
        w_oih = jnp.transpose(w, (2, 1, 0)).astype(conv_dtype)   # (K,Cin,Cout)->(Cout,Cin,K)
        y = lax.conv_general_dilated(
            h.astype(conv_dtype), w_oih, window_strides=(1,),
            padding=[(dila, dila)], rhs_dilation=(dila,),
            dimension_numbers=("NCH", "OIH", "NCH"),
            preferred_element_type=jnp.float32)
        return y + b[None, :, None]

    h = jnp.maximum(x_ncl, 0.0)
    h = conv(h, w1, b1)
    h = jnp.maximum(h, 0.0)
    h = conv(h, w2, b2)
    return x_ncl + h


if __name__ == "__main__":
    dila_size = 2
    N, C, L = 2, FILTER_SIZE, 16

    key = jax.random.PRNGKey(0)
    kx, kw1, kb1, kw2, kb2 = jax.random.split(key, 5)

    # PyTorch-layout input (N, C, L)
    x_ncl = jax.random.normal(kx, (N, C, L), dtype=jnp.float32)

    # Synthetic weights: stored as (K, C_in, C_out), biases (C,)
    scale = 1.0 / (C * KERNEL_SIZE) ** 0.5
    w1 = jax.random.normal(kw1, (KERNEL_SIZE, C, C), dtype=jnp.float32) * scale
    b1 = jax.random.normal(kb1, (C,), dtype=jnp.float32) * scale
    w2 = jax.random.normal(kw2, (KERNEL_SIZE, C, C), dtype=jnp.float32) * scale
    b2 = jax.random.normal(kb2, (C,), dtype=jnp.float32) * scale

    # NCL -> NLC for the kernel, back to NCL after.
    x_nlc = jnp.transpose(x_ncl, (0, 2, 1))
    out_nlc = res_dila_cnn_block(x_nlc, w1, b1, w2, b2, dila=dila_size)
    out_nlc = jax.block_until_ready(out_nlc)
    out_ncl = jnp.transpose(out_nlc, (0, 2, 1))

    # Tight check vs. a reference that also feeds bf16 to the convs
    # (f32 accumulation in both) — validates the kernel math exactly.
    ref_bf16 = reference_ncl(x_ncl, w1, b1, w2, b2, dila=dila_size,
                             conv_dtype=jnp.bfloat16)
    assert jnp.allclose(out_ncl, ref_bf16, atol=1e-2, rtol=1e-2), \
        "mismatch vs bf16-matched reference"

    # Loose sanity check vs. the pure-f32 PyTorch-equivalent reference
    # (difference is only the intentional bf16 cast of the conv inputs/weights).
    ref_f32 = reference_ncl(x_ncl, w1, b1, w2, b2, dila=dila_size,
                            conv_dtype=jnp.float32)
    assert jnp.allclose(out_ncl, ref_f32, atol=1e-1, rtol=1e-1), \
        "mismatch vs f32 reference"

    # TODO(synk): nn.Dropout is constructed in __init__ but never applied in
    # forward(), so it is intentionally omitted here.
    print("KERNEL_OK")
</pallas_src>

<mosaic_0001>
module attributes {stable_mosaic.version = 11 : i64} {
  func.func @res_dila_block_kernel(%arg0: i32, %arg1: memref<1x16x64xf32, #tpu.memory_space<vmem>>, %arg2: memref<192x64xbf16, #tpu.memory_space<vmem>>, %arg3: memref<1x64xf32, #tpu.memory_space<vmem>>, %arg4: memref<192x64xbf16, #tpu.memory_space<vmem>>, %arg5: memref<1x64xf32, #tpu.memory_space<vmem>>, %arg6: memref<1x16x64xf32, #tpu.memory_space<vmem>>) attributes {dimension_semantics = [#tpu.dimension_semantics<parallel>], iteration_bounds = array<i64: 2>, scalar_prefetch = 0 : i64, scratch_operands = 0 : i64, tpu.core_type = #tpu.core_type<tc>, window_params = [{transform_indices = @transform_0, window_bounds = array<i64: 1, 16, 64>}, {pipeline_mode = #tpu.pipeline_mode<synchronous>, transform_indices = @transform_1, window_bounds = array<i64: 192, 64>}, {pipeline_mode = #tpu.pipeline_mode<synchronous>, transform_indices = @transform_2, window_bounds = array<i64: 1, 64>}, {pipeline_mode = #tpu.pipeline_mode<synchronous>, transform_indices = @transform_3, window_bounds = array<i64: 192, 64>}, {pipeline_mode = #tpu.pipeline_mode<synchronous>, transform_indices = @transform_4, window_bounds = array<i64: 1, 64>}, {transform_indices = @transform_5, window_bounds = array<i64: 1, 16, 64>}]} {
    %c0 = arith.constant 0 : index
    %c0_0 = arith.constant 0 : index
    %c0_1 = arith.constant 0 : index
    %0 = vector.load %arg1[%c0, %c0_0, %c0_1] : memref<1x16x64xf32, #tpu.memory_space<vmem>>, vector<1x16x64xf32>
    %1 = vector.shape_cast %0 : vector<1x16x64xf32> to vector<16x64xf32>
    %2 = tpu.iota {dimensions = array<i32: 0>} : vector<16x1xi32>
    %c16_i32 = arith.constant 16 : i32
    %c0_i32 = arith.constant 0 : i32
    %3 = arith.cmpi eq, %c16_i32, %c0_i32 : i32
    %c1_i32 = arith.constant 1 : i32
    %4 = arith.select %3, %c1_i32, %c16_i32 : i32
    %5 = vector.broadcast %4 : i32 to vector<16x1xi32>
    %6 = arith.remsi %2, %5 : vector<16x1xi32>
    %c0_i32_2 = arith.constant 0 : i32
    %7 = vector.broadcast %c0_i32_2 : i32 to vector<16x1xi32>
    %8 = arith.cmpi ne, %6, %7 : vector<16x1xi32>
    %c0_i32_3 = arith.constant 0 : i32
    %9 = vector.broadcast %c0_i32_3 : i32 to vector<16x1xi32>
    %10 = arith.cmpi slt, %6, %9 : vector<16x1xi32>
    %c0_i32_4 = arith.constant 0 : i32
    %11 = arith.cmpi slt, %4, %c0_i32_4 : i32
    %12 = vector.broadcast %11 : i1 to vector<16x1xi1>
    %13 = vector.broadcast %12 : vector<16x1xi1> to vector<16x1xi1>
    %14 = arith.xori %10, %13 : vector<16x1xi1>
    %15 = arith.andi %14, %8 : vector<16x1xi1>
    %16 = vector.broadcast %4 : i32 to vector<16x1xi32>
    %17 = arith.addi %6, %16 : vector<16x1xi32>
    %18 = arith.select %15, %17, %6 : vector<16x1xi1>, vector<16x1xi32>
    %c2_i32 = arith.constant 2 : i32
    %19 = vector.broadcast %c2_i32 : i32 to vector<16x1xi32>
    %20 = arith.cmpi sge, %18, %19 : vector<16x1xi32>
    %c14_i32 = arith.constant 14 : i32
    %21 = vector.broadcast %c14_i32 : i32 to vector<16x1xi32>
    %22 = arith.cmpi slt, %18, %21 : vector<16x1xi32>
    %cst = arith.constant 0.000000e+00 : f32
    %23 = vector.broadcast %cst : f32 to vector<16x64xf32>
    %24 = arith.maximumf %1, %23 : vector<16x64xf32>
    %c2_i32_5 = arith.constant 2 : i32
    %25 = tpu.dynamic_rotate %24 by %c2_i32_5 dim 0 : vector<16x64xf32>, i32 -> vector<16x64xf32>
    %cst_6 = arith.constant 0.000000e+00 : f32
    %26 = vector.shape_cast %20 : vector<16x1xi1> to vector<16x1xi1>
    %27 = vector.broadcast %26 : vector<16x1xi1> to vector<16x64xi1>
    %28 = vector.broadcast %cst_6 : f32 to vector<16x64xf32>
    %29 = arith.select %27, %25, %28 : vector<16x64xi1>, vector<16x64xf32>
    %c14_i32_7 = arith.constant 14 : i32
    %30 = tpu.dynamic_rotate %24 by %c14_i32_7 dim 0 : vector<16x64xf32>, i32 -> vector<16x64xf32>
    %cst_8 = arith.constant 0.000000e+00 : f32
    %31 = vector.shape_cast %22 : vector<16x1xi1> to vector<16x1xi1>
    %32 = vector.broadcast %31 : vector<16x1xi1> to vector<16x64xi1>
    %33 = vector.broadcast %cst_8 : f32 to vector<16x64xf32>
    %34 = arith.select %32, %30, %33 : vector<16x64xi1>, vector<16x64xf32>
    %35 = tpu.concatenate %29, %24, %34 in 1 : vector<16x64xf32>, vector<16x64xf32>, vector<16x64xf32> -> vector<16x192xf32>
    %36 = arith.truncf %35 : vector<16x192xf32> to vector<16x192xbf16>
    %c0_9 = arith.constant 0 : index
    %c0_10 = arith.constant 0 : index
    %37 = vector.load %arg2[%c0_9, %c0_10] : memref<192x64xbf16, #tpu.memory_space<vmem>>, vector<192x64xbf16>
    %cst_11 = arith.constant dense<0.000000e+00> : vector<16x64xf32>
    %38 = tpu.matmul %36, %37, %cst_11 {dimension_numbers = #tpu.dot_dimension_numbers<[1], [0], [0], [1], [0, 0, 1, 1], [], []>} : vector<16x192xbf16>, vector<192x64xbf16>, vector<16x64xf32> -> vector<16x64xf32>
    %c0_12 = arith.constant 0 : index
    %c0_13 = arith.constant 0 : index
    %39 = vector.load %arg3[%c0_12, %c0_13] : memref<1x64xf32, #tpu.memory_space<vmem>>, vector<1x64xf32>
    %40 = vector.broadcast %39 : vector<1x64xf32> to vector<16x64xf32>
    %41 = arith.addf %38, %40 : vector<16x64xf32>
    %cst_14 = arith.constant 0.000000e+00 : f32
    %42 = vector.broadcast %cst_14 : f32 to vector<16x64xf32>
    %43 = arith.maximumf %41, %42 : vector<16x64xf32>
    %c2_i32_15 = arith.constant 2 : i32
    %44 = tpu.dynamic_rotate %43 by %c2_i32_15 dim 0 : vector<16x64xf32>, i32 -> vector<16x64xf32>
    %cst_16 = arith.constant 0.000000e+00 : f32
    %45 = vector.shape_cast %20 : vector<16x1xi1> to vector<16x1xi1>
    %46 = vector.broadcast %45 : vector<16x1xi1> to vector<16x64xi1>
    %47 = vector.broadcast %cst_16 : f32 to vector<16x64xf32>
    %48 = arith.select %46, %44, %47 : vector<16x64xi1>, vector<16x64xf32>
    %c14_i32_17 = arith.constant 14 : i32
    %49 = tpu.dynamic_rotate %43 by %c14_i32_17 dim 0 : vector<16x64xf32>, i32 -> vector<16x64xf32>
    %cst_18 = arith.constant 0.000000e+00 : f32
    %50 = vector.shape_cast %22 : vector<16x1xi1> to vector<16x1xi1>
    %51 = vector.broadcast %50 : vector<16x1xi1> to vector<16x64xi1>
    %52 = vector.broadcast %cst_18 : f32 to vector<16x64xf32>
    %53 = arith.select %51, %49, %52 : vector<16x64xi1>, vector<16x64xf32>
    %54 = tpu.concatenate %48, %43, %53 in 1 : vector<16x64xf32>, vector<16x64xf32>, vector<16x64xf32> -> vector<16x192xf32>
    %55 = arith.truncf %54 : vector<16x192xf32> to vector<16x192xbf16>
    %c0_19 = arith.constant 0 : index
    %c0_20 = arith.constant 0 : index
    %56 = vector.load %arg4[%c0_19, %c0_20] : memref<192x64xbf16, #tpu.memory_space<vmem>>, vector<192x64xbf16>
    %cst_21 = arith.constant dense<0.000000e+00> : vector<16x64xf32>
    %57 = tpu.matmul %55, %56, %cst_21 {dimension_numbers = #tpu.dot_dimension_numbers<[1], [0], [0], [1], [0, 0, 1, 1], [], []>} : vector<16x192xbf16>, vector<192x64xbf16>, vector<16x64xf32> -> vector<16x64xf32>
    %c0_22 = arith.constant 0 : index
    %c0_23 = arith.constant 0 : index
    %58 = vector.load %arg5[%c0_22, %c0_23] : memref<1x64xf32, #tpu.memory_space<vmem>>, vector<1x64xf32>
    %59 = vector.broadcast %58 : vector<1x64xf32> to vector<16x64xf32>
    %60 = arith.addf %57, %59 : vector<16x64xf32>
    %61 = arith.addf %1, %60 : vector<16x64xf32>
    %62 = vector.shape_cast %61 : vector<16x64xf32> to vector<1x16x64xf32>
    %c0_24 = arith.constant 0 : index
    %c0_25 = arith.constant 0 : index
    %c0_26 = arith.constant 0 : index
    %63 = vector.load %arg6[%c0_24, %c0_25, %c0_26] : memref<1x16x64xf32, #tpu.memory_space<vmem>>, vector<1x16x64xf32>
    tpu.vector_store %arg6[%c0_24, %c0_25, %c0_26], %62 {strides = array<i32>} : memref<1x16x64xf32, #tpu.memory_space<vmem>>, vector<1x16x64xf32>,
    return
  }
  func.func @transform_0(%arg0: i32) -> (i32, i32, i32) {
    %c0_i32 = arith.constant 0 : i32
    %c0_i32_0 = arith.constant 0 : i32
    %c0_i32_1 = arith.constant 0 : i32
    return %arg0, %c0_i32, %c0_i32_0 : i32, i32, i32
  }
  func.func @transform_1(%arg0: i32) -> (i32, i32) {
    %c0_i32 = arith.constant 0 : i32
    %c0_i32_0 = arith.constant 0 : i32
    %c0_i32_1 = arith.constant 0 : i32
    return %c0_i32, %c0_i32_0 : i32, i32
  }
  func.func @transform_2(%arg0: i32) -> (i32, i32) {
    %c0_i32 = arith.constant 0 : i32
    %c0_i32_0 = arith.constant 0 : i32
    %c0_i32_1 = arith.constant 0 : i32
    return %c0_i32, %c0_i32_0 : i32, i32
  }
  func.func @transform_3(%arg0: i32) -> (i32, i32) {
    %c0_i32 = arith.constant 0 : i32
    %c0_i32_0 = arith.constant 0 : i32
    %c0_i32_1 = arith.constant 0 : i32
    return %c0_i32, %c0_i32_0 : i32, i32
  }
  func.func @transform_4(%arg0: i32) -> (i32, i32) {
    %c0_i32 = arith.constant 0 : i32
    %c0_i32_0 = arith.constant 0 : i32
    %c0_i32_1 = arith.constant 0 : i32
    return %c0_i32, %c0_i32_0 : i32, i32
  }
  func.func @transform_5(%arg0: i32) -> (i32, i32, i32) {
    %c0_i32 = arith.constant 0 : i32
    %c0_i32_0 = arith.constant 0 : i32
    %c0_i32_1 = arith.constant 0 : i32
    return %arg0, %c0_i32, %c0_i32_0 : i32, i32, i32
  }
}

</mosaic_0001>

<bundles_post_ra>
// kernel: tpu_custom_call.1
= control target key start
LH: loop header
LB: loop body
LE: loop exit
PB: predicated region body
PF: predicated region fallthrough
CT: control target
= control target key end

     0   :  { %10 = vsyncpa [#allocation3], 0  ;;  %s1170_s0 = inlined_call_operand.vmem [shape: f32[2,16,64], index: 0, kind: input, shape index: {}]   ;;  %s1171_s1 = inlined_call_operand.vmem [shape: bf16[192,64], index: 1, kind: input, shape index: {}]   ;;  %s1172_s2 = inlined_call_operand.vmem [shape: f32[1,64], index: 2, kind: input, shape index: {}]   ;;  %s1173_s3 = inlined_call_operand.vmem [shape: bf16[192,64], index: 3, kind: input, shape index: {}]   ;;  %s1174_s4 = inlined_call_operand.vmem [shape: f32[1,64], index: 4, kind: input, shape index: {}]   ;;  %s1175_s5 = inlined_call_operand.hbm [shape: f32[2,16,64], index: 5, kind: output, shape index: {}]  }
   0x1   :  { %12 = vsyncpa [#allocation3 + $0x1], 0  ;;  %s951_s18 = smov 0   ;;  %s953_s19 = smov 0  }
   0x2   :  { %s955_s20 = smov 0   ;;  %s957_s21 = smov 0  }
   0x3 LB: > { %s972_s22 = sadd.s32 4294967295, %s916_s21   ;;  %s664_s23 = sadd.s32 4294967294, %s916_s21   ;;  %s916_s21 = sphi %s957_s21, %s1185_s21   ;;  %s912_s20 = sphi %s955_s20, %s1184_s20   ;;  %s908_s19 = sphi %s953_s19, %s1183_s19   ;;  %s904_s18 = sphi %s951_s18, %s1182_s18  }
   0x4   : > { %s976_s24 = sadd.s32 1, %s916_s21   ;;  %s135_s25 = sadd.s32 1, %s912_s20 }
   0x5   : > { %s132_s26 = ssub.s32 %s916_s21, %s976_s24  ;;  %p145_p0 = scmp.ne.s32.totalorder %s912_s20, %s908_s19 }
   0x6   : > { %p133_p1 = scmp.eq.s32.totalorder %s132_s26, 0  ;;  %p146_p2 = scmp.eq.s32.totalorder %s972_s22, 1 }
   0x7   : > { %p151_p3 = scmp.ne.s32.totalorder %s908_s19, %s904_s18  ;;  %p152_p4 = scmp.eq.s32.totalorder %s664_s23, 1 }
   0x8   : > { %s987_s27 = scalar_select %p133_p1, %s912_s20, %s135_s25  }
   0x9   : > { %p989_p5 = por %p146_p2, %p145_p0  ;;  %p993_p6 = por %p152_p4, %p151_p3 }
   0xa   : > { %p667_p7 = scmp.ge.s32.totalorder %s916_s21, 1  ;;  %p190_p8 = scmp.lt.s32.totalorder %s916_s21, 3 }
   0xc   : > { %p191_p9 = pnand %p667_p7, %p190_p8 }
   0xd   : > { %p218_p10 = scmp.lt.s32.totalorder (!%p191_p9), %s972_s22, 1  ;;  %s918_s8 = smov (!%p191_p9), 64  }
   0xe   : > { %194 = sbr.rel (%p191_p9) target bundleno = 560 (0x230), region = 40  ;;  %s215_s16 = sand.u32 (!%p191_p9), 1, %s908_s19  }
   0xf   : > { %s799_s23 = sshll.u32 (!%p191_p9), %s972_s22, 4  ;;  %s874_s13 = scalar_lea.hbm (!%p191_p9), %s1175_s5, 32 }
  0x10   : > { %s598_s30 = scalar_lea.hbm (!%p191_p9), %s1175_s5, %s799_s23 }
  0x13   : > { %v782_v0 = vld [vmem:[%s1171_s1 + $0x38] sm:$0xff]  ;;  %s219_s9 = scalar_select %p218_p10, %s972_s22, 1  ;;  %v781_v2 = vld [vmem:[%s1171_s1 + $0x30] sm:$0xff]  ;;  %v780_v6 = vld [vmem:[%s1171_s1 + $0x28] sm:$0xff]  ;;  %v226_v16 = vlaneseq  ;;  %vm289_vm2 = vcmask 523264  }
  0x14   : > { %v786_v1 = vld [vmem:[%s1171_s1 + $0x58] sm:$0xff]  ;;  %397 = vmatpush.bf16.msra.mxu0 %v782_v0  ;;  %v785_v3 = vld [vmem:[%s1171_s1 + $0x50] sm:$0xff]  ;;  %v784_v9 = vld [vmem:[%s1171_s1 + $0x48] sm:$0xff]  ;;  %s587_s22 = scalar_lea.sflag [#allocation3], %s215_s16 }
  0x15   : > { %415 = vmatpush.bf16.msra.mxu1 %v786_v1  ;;  %s774_s14 = sshll.u32 %s219_s9, 4  ;;  %v779_v11 = vld [vmem:[%s1171_s1 + $0x20] sm:$0xff]  ;;  %v778_v13 = vld [vmem:[%s1171_s1 + $0x18] sm:$0xff]  ;;  %v777_v14 = vld [vmem:[%s1171_s1 + $0x10] sm:$0xff]  ;;  %v1044_v17 = vshrl.u32 %v226_v16, 7  ;;  %s601_s9 = sshll.u32 %s598_s30, 4  ;;  %s602_s9 = int_to_ptr.hbm [resolvable:$true] %s601_s9 }
  0x16   : > { %s222_s17 = scalar_lea.vmem %s1170_s0, %s774_s14  ;;  %v783_v12 = vld [vmem:[%s1171_s1 + $0x40] sm:$0xff]  ;;  %v776_v15 = vld [vmem:[%s1171_s1 + $0x8] sm:$0xff]  ;;  %v798_v41 = vld [vmem:[%s1173_s3 + $0x58] sm:$0xff]  ;;  %s868_s10 = sshra.s32 %s602_s9, 4  ;;  %s869_s10 = int_to_ptr.hbm [resolvable:$true] %s868_s10 }
  0x17   : > { %v1016_v4 = vld [vmem:[%s222_s17] sm:$0xff]  ;;  %v1018_v5 = vld [vmem:[%s222_s17 + $0x8] sm:$0xff]  ;;  %v228_v18 = vadd.s32 8, %v1044_v17  ;;  %vm272_vm0 = vcmp.lt.s32.totalorder %v1044_v17, 6  ;;  %v233_v28 = vand.u32 15, %v1044_v17  ;;  %vm261_vm3 = vcmp.lt.s32.totalorder %v1044_v17, 2  ;;  %572 = vmatpush.bf16.msra.mxu3 %v798_v41  ;;  %p875_p0 = scmp.lt.s32.totalorder %s869_s10, %s1175_s5 }
  0x18   : > { %398 = vmatpush.bf16.msra.mxu0 %v781_v2  ;;  %v257_v7 = vmax.f32 %v1016_v4, 0.0  ;;  %v258_v8 = vmax.f32 %v1018_v5, 0.0  ;;  %v775_v27 = vld [vmem:[%s1171_s1] sm:$0xff]  ;;  %v797_v42 = vld [vmem:[%s1173_s3 + $0x50] sm:$0xff]  ;;  %v796_v43 = vld [vmem:[%s1173_s3 + $0x48] sm:$0xff]  ;;  %s668_s17 = sshll.u32 %s215_s16, 4 }
  0x19   : > { %416 = vmatpush.bf16.msra.mxu1 %v785_v3  ;;  %v240_v19 = vand.u32 15, %v228_v18  ;;  %vm1064_vm4 = vcmp.ge.s32.totalorder %v233_v28, 2  ;;  %v795_v44 = vld [vmem:[%s1173_s3 + $0x40] sm:$0xff]  ;;  %v794_v45 = vld [vmem:[%s1173_s3 + $0x38] sm:$0xff]  ;;  %v793_v46 = vld [vmem:[%s1173_s3 + $0x30] sm:$0xff]  ;;  %s217_s6 = scalar_lea.vmem [#allocation2], %s668_s17 }
  0x1a   : > { %v842_v10 = vpack.i.bf16 %v258_v8, %v257_v7  ;;  %v270_v20 = vrot.slane %v257_v7, 2  ;;  %v271_v21 = vrot.slane %v258_v8, 2  ;;  %v259_v29 = vrot.slane %v257_v7, 6  ;;  %554 = vmatpush.bf16.msra.mxu2 %v794_v45  ;;  %v792_v47 = vld [vmem:[%s1173_s3 + $0x28] sm:$0xff]  ;;  %v852_v48 = vld [vmem:[%s1172_s2] ss:$0 sm:$0xff] }
  0x1b   : > { %vm1048_vm1 = vcmp.lt.s32.totalorder %v240_v19, 14  ;;  %v260_v30 = vrot.slane %v258_v8, 6  ;;  %573 = vmatpush.bf16.msra.mxu3 %v797_v42  ;;  %v791_v49 = vld [vmem:[%s1173_s3 + $0x20] sm:$0xff]  ;;  %v790_v53 = vld [vmem:[%s1173_s3 + $0x18] sm:$0xff]  ;;  %v789_v55 = vld [vmem:[%s1173_s3 + $0x10] sm:$0xff]  ;;  %s599_s7 = sshll.u32 %s217_s6, 4  ;;  %s600_s7 = int_to_ptr.vmem [resolvable:$true] %s599_s7 }
  0x1c   : > { %399 = vmatpush.bf16.msra.mxu0 %v780_v6  ;;  %843 = vrot.lane.b32.xlu0 %v842_v10, %s918_s8  ;;  %v274_v23 = vsel %vm272_vm0, %v271_v21, %v270_v20  ;;  %v273_v24 = vsel %vm272_vm0, %v270_v20, %v271_v21  ;;  %v788_v61 = vld [vmem:[%s1173_s3 + $0x8] sm:$0xff]  ;;  %v853_v20 = vld [vmem:[%s1174_s4] ss:$0 sm:$0xff]  ;;  %s870_s11 = scalar_lea.hbm %s869_s10, 16 }
  0x1d   : > { %417 = vmatpush.bf16.msra.mxu1 %v784_v9  ;;  %v280_v25 = vsel %vm1048_vm1, %v274_v23, 0.0  ;;  %v263_v32 = vsel %vm261_vm3, %v260_v30, %v259_v29  ;;  %v262_v34 = vsel %vm261_vm3, %v259_v29, %v260_v30  ;;  %p871_p11 = scmp.ne.s32.totalorder %s869_s10, %s870_s11  ;;  %p876_p1 = scmp.lt.s32.totalorder %s874_s13, %s870_s11 }
  0x1e   : > { %v293_v26 = vpack.c.bf16 %v280_v25, %v273_v24  ;;  %v268_v35 = vsel %vm1064_vm4, %v263_v32, 0.0  ;;  %555 = vmatpush.bf16.msra.mxu2 %v793_v46 }
  0x1f   : > { %574 = vmatpush.bf16.msra.mxu3 %v796_v43  ;;  %p872_p12 = pnand %p871_p11, %p989_p5  ;;  %p877_p2 = por %p876_p1, %p875_p0 }
  0x20   : > { %400 = vmatpush.bf16.msra.mxu0 %v779_v11 }
  0x21   : > { %418 = vmatpush.bf16.msra.mxu1 %v783_v12  ;;  %v787_v12 = vld [vmem:[%s1173_s3] sm:$0xff]  ;;  %p873_p13 = pneg %p872_p12 }
  0x22   : > { %556 = vmatpush.bf16.msra.mxu2 %v792_v47 }
  0x23   : > { %575 = vmatpush.bf16.msra.mxu3 %v795_v44  ;;  %p878_p3 = pnand %p877_p2, %p873_p13 }
  0x24   : > { %401 = vmatpush.bf16.msra.mxu0 %v778_v13  ;;  %719 = vmatmul.msk.bf16.vlgmr.msra.gmra.mxu1 %vm289_vm2, %v293_v26 }
  0x26   : > { %557 = vmatpush.bf16.msra.mxu2 %v791_v49 }
  0x28   : > { %402 = vmatpush.bf16.msra.mxu0 %v777_v14 }
  0x2a   : > { %558 = vmatpush.bf16.msra.mxu2 %v790_v53 }
  0x2c   : > { %403 = vmatpush.bf16.msra.mxu0 %v776_v15 }
  0x2e   : > { %559 = vmatpush.bf16.msra.mxu2 %v789_v55 }
  0x30   : > { %404 = vmatpush.bf16.msra.mxu0 %v775_v27 }
  0x32   : > { %560 = vmatpush.bf16.msra.mxu2 %v788_v61 }
  0x36   : > { %561 = vmatpush.bf16.msra.mxu2 %v787_v12 }
  0x8e   : > { %v844_v33 = vpop.permute.xlu0 %843 }
  0x8f   : > { %v846_v36 = vunpack.i.h.bf16 %v844_v33  ;;  %v845_v37 = vunpack.i.l.bf16 %v844_v33 }
  0x91   : > { %v290_v38 = vsel %vm289_vm2, %v268_v35, %v845_v37  ;;  %v291_v39 = vsel %vm289_vm2, %v262_v34, %v846_v36 }
  0x92   : > { %v292_v40 = vpack.c.bf16 %v291_v39, %v290_v38 }
  0x94   : > { %405 = vmatmul.bf16.vlgmr.msra.gmra.mxu0 %v292_v40 }
  0xa1   : > { %v420_v50 = vpop.f32.mrf.mxu1 }
  0xa9   : > { %v422_v59 = vpop.f32.mrf.mxu1 }
 0x111   : > { %v406_v51 = vpop.f32.mrf.mxu0 }
 0x112   : > { %v407_v52 = vadd.f32 %v852_v48, %v406_v51 }
 0x114   : > { %v421_v54 = vadd.f32 %v420_v50, %v407_v52 }
 0x116   : > { %v425_v58 = vmax.f32 %v421_v54, 0.0 }
 0x118   : > { %v427_v63 = vrot.slane %v425_v58, 6  ;;  %v433_v0 = vrot.slane %v425_v58, 2 }
 0x119   : > { %v408_v56 = vpop.f32.mrf.mxu0 }
 0x11a   : > { %v409_v57 = vadd.f32 %v852_v48, %v408_v56 }
 0x11c   : > { %v423_v60 = vadd.f32 %v422_v59, %v409_v57 }
 0x11e   : > { %v426_v62 = vmax.f32 %v423_v60, 0.0 }
 0x120   : > { %v428_v1 = vrot.slane %v426_v62, 6  ;;  %v434_v2 = vrot.slane %v426_v62, 2  ;;  %v847_v3 = vpack.i.bf16 %v426_v62, %v425_v58 }
 0x122   : > { %848 = vrot.lane.b32.xlu0 %v847_v3, %s918_s8  ;;  %v435_v6 = vsel %vm272_vm0, %v433_v0, %v434_v2  ;;  %v436_v7 = vsel %vm272_vm0, %v434_v2, %v433_v0  ;;  %v429_v8 = vsel %vm261_vm3, %v427_v63, %v428_v1  ;;  %v430_v9 = vsel %vm261_vm3, %v428_v1, %v427_v63 }
 0x123   : > { %v438_v10 = vsel %vm1048_vm1, %v436_v7, 0.0  ;;  %v431_v16 = vsel %vm1064_vm4, %v430_v9, 0.0 }
 0x124   : > { %v450_v11 = vpack.c.bf16 %v438_v10, %v435_v6 }
 0x126   : > { %768 = vmatmul.msk.bf16.vlgmr.msra.gmra.mxu3 %vm289_vm2, %v450_v11 }
 0x194   : > { %v849_v13 = vpop.permute.xlu0 %848 }
 0x195   : > { %v851_v14 = vunpack.i.h.bf16 %v849_v13  ;;  %v850_v15 = vunpack.i.l.bf16 %v849_v13 }
 0x197   : > { %v447_v17 = vsel %vm289_vm2, %v431_v16, %v850_v15  ;;  %v448_v18 = vsel %vm289_vm2, %v429_v8, %v851_v14 }
 0x198   : > { %v449_v19 = vpack.c.bf16 %v448_v18, %v447_v17 }
 0x19a   : > { %562 = vmatmul.bf16.vlgmr.msra.gmra.mxu2 %v449_v19 }
 0x1a9   : > { %v577_v21 = vpop.f32.mrf.mxu3 }
 0x1b1   : > { %v579_v28 = vpop.f32.mrf.mxu3 }
 0x21d   : > { %v563_v22 = vpop.f32.mrf.mxu2 }
 0x21e   : > { %v564_v23 = vadd.f32 %v853_v20, %v563_v22 }
 0x220   : > { %v578_v24 = vadd.f32 %v577_v21, %v564_v23 }
 0x222   : > { %v582_v25 = vadd.f32 %v578_v24, %v1016_v4 }
 0x224   : > { %584 = vst.msk [vmem:[%s217_s6] sm:$0xff] %vm289_vm2, %v582_v25 }
 0x225   : > { %v565_v26 = vpop.f32.mrf.mxu2 }
 0x226   : > { %v566_v27 = vadd.f32 %v853_v20, %v565_v26 }
 0x228   : > { %v580_v29 = vadd.f32 %v579_v28, %v566_v27 }
 0x22a   : > { %v583_v30 = vadd.f32 %v580_v29, %v1018_v5 }
 0x22c   : > { %585 = vst.msk [vmem:[%s217_s6 + $0x8] sm:$0xff] %vm289_vm2, %v583_v30 }
 0x22d   : > { %881 = shalt.err (!%p878_p3)
}
 0x22e   : > { %s919_s16 = smov 128   ;;  %s920_s17 = smov 8  }
 0x22f   : > { %800 = dma.vmem_to_hbm [thread:$0]  (%p989_p5), %s600_s7, 256, %s602_s9, %s587_s22, %s919_s16, %s919_s16, %s920_s17  }
 0x230 PF: > { %p806_p4 = scmp.ge.s32.totalorder %s916_s21, 2  ;;  %s616_s23 = sand.u32 1, %s904_s18  }
 0x231   : > { %s617_s25 = scalar_lea.sflag [#allocation3], %s616_s23 }
 0x232   : > { %p803_p7 = pnand %p806_p4, %p993_p6 }
 0x234   : > { %p804_p8 = pneg %p803_p7 }
 0x236   : > { %899 = dma.done.wait (%p804_p8), %s617_s25, 256  }
 0x237   : > { %901 = vsyncadd (%p804_p8), %s617_s25, 4294967040  ;;  %p15_p9 = scmp.ge.s32.totalorder %s976_s24, 4   ;;  %s1182_s18 = smov %s908_s19 }
 0x238   : > { %s1183_s19 = smov %s912_s20  ;;  %s1184_s20 = smov %s987_s27 }
 0x239   : > { %s1185_s21 = smov %s976_s24  ;;  %17 = sbr.rel (!%p15_p9) target bundleno = 3 (0x3), region = 75 }
 0x23e   :  { %623 = vsyncpa [#allocation3], 1 }
 0x23f   :  { %625 = vsyncpa [#allocation3 + $0x1], 1 }

</bundles_post_ra>
